<compile_context>
chip_gen: v6e
topology: v6e:2x2x1
jax: 0.10.0
libtpu: 0.0.40
codegen_flags: <defaults>
</compile_context>

<pallas_src>
import jax
import jax.numpy as jnp
from jax.experimental import pallas as pl
from jax.experimental.pallas import tpu as pltpu


def _hardswish_kernel(x_ref, o_ref):
    x = x_ref[...].astype(jnp.float32)
    # relu6(x + 3) * (1/6)  ->  multiply by 1/6 (cheap VPU mul, no divide).
    hsig = jnp.clip(x + 3.0, 0.0, 6.0) * (1.0 / 6.0)
    o_ref[...] = (x * hsig).astype(o_ref.dtype)


def _round_up(a, b):
    return (a + b - 1) // b * b


def hardswish_pallas(x):
    """Elementwise HardSwish over an arbitrarily-shaped array (e.g. NCHW)."""
    orig_shape = x.shape
    total = x.size
    if total == 0:
        return x

    flat = x.reshape(-1)
    itemsize = jnp.dtype(x.dtype).itemsize

    # Pick a lane count (multiple of 128) that divides the element count so no
    # padding is needed; otherwise fall back to 128 lanes (pads < 128 elems).
    lane = None
    for cand in (1024, 512, 256, 128):
        if total % cand == 0:
            lane = cand
            break
    if lane is None:
        lane = 128

    rows = pl.cdiv(total, lane)
    padded_total = rows * lane
    if padded_total != total:
        # hardswish(0) == 0, so zero padding is numerically safe.
        flat = jnp.pad(flat, (0, padded_total - total))
    x2d = flat.reshape(rows, lane)

    # Byte-based block sizing: ~4 MiB per block buffer regardless of dtype.
    # With input + output double-buffered that is ~16 MiB of VMEM.
    target_block_bytes = 4 * 1024 * 1024
    block_rows = max(32, (target_block_bytes // (lane * itemsize)) // 32 * 32)

    if rows <= block_rows:
        if rows >= 64:
            # Split into >=2 blocks so a v7x "parallel" grid can use both TCs.
            block_rows = _round_up(pl.cdiv(rows, 2), 32)
        else:
            # Single full-extent block (block shape == array shape is valid).
            block_rows = rows
    # else: rows > block_rows already gives >=2 blocks; the ragged final block
    # (if any) is masked automatically by Pallas.

    grid = (pl.cdiv(rows, block_rows),)

    cost = pl.CostEstimate(
        flops=5 * total,
        transcendentals=0,
        bytes_accessed=2 * total * itemsize,
    )

    out2d = pl.pallas_call(
        _hardswish_kernel,
        out_shape=jax.ShapeDtypeStruct((rows, lane), x.dtype),
        grid_spec=pltpu.PrefetchScalarGridSpec(
            num_scalar_prefetch=0,
            grid=grid,
            in_specs=[pl.BlockSpec((block_rows, lane), lambda i: (i, 0))],
            out_specs=pl.BlockSpec((block_rows, lane), lambda i: (i, 0)),
        ),
        compiler_params=pltpu.CompilerParams(
            dimension_semantics=("parallel",),
            vmem_limit_bytes=32 * 1024 * 1024,
        ),
        cost_estimate=cost,
    )(x2d)

    out_flat = out2d.reshape(-1)
    if padded_total != total:
        out_flat = out_flat[:total]
    return out_flat.reshape(orig_shape)


def _reference(x):
    """Pure-JAX reference mirroring the torch code verbatim."""
    return x * jnp.clip(x + 3.0, 0.0, 6.0) / 6.0


if __name__ == "__main__":
    key = jax.random.PRNGKey(0)
    # NCHW input, small shape; scale so both saturation regions of relu6 are hit.
    x = 4.0 * jax.random.normal(key, (2, 4, 16, 16), dtype=jnp.float32)

    y = hardswish_pallas(x)
    y = jax.block_until_ready(y)

    y_ref = _reference(x)
    assert y.shape == x.shape
    assert jnp.allclose(y, y_ref, atol=1e-5, rtol=1e-6), "mismatch vs reference"

    print("KERNEL_OK")
</pallas_src>

<mosaic_0001>
module attributes {stable_mosaic.version = 11 : i64} {
  func.func @_hardswish_kernel(%arg0: i32, %arg1: memref<2x1024xf32, #tpu.memory_space<vmem>>, %arg2: memref<2x1024xf32, #tpu.memory_space<vmem>>) attributes {dimension_semantics = [#tpu.dimension_semantics<parallel>], iteration_bounds = array<i64: 1>, scalar_prefetch = 0 : i64, scratch_operands = 0 : i64, tpu.core_type = #tpu.core_type<tc>, window_params = [{transform_indices = @transform_0, window_bounds = array<i64: 2, 1024>}, {transform_indices = @transform_1, window_bounds = array<i64: 2, 1024>}]} {
    %c0 = arith.constant 0 : index
    %c0_0 = arith.constant 0 : index
    %0 = vector.load %arg1[%c0, %c0_0] : memref<2x1024xf32, #tpu.memory_space<vmem>>, vector<2x1024xf32>
    %cst = arith.constant 3.000000e+00 : f32
    %1 = vector.broadcast %cst : f32 to vector<2x1024xf32>
    %2 = arith.addf %0, %1 : vector<2x1024xf32>
    %cst_1 = arith.constant 0.000000e+00 : f32
    %cst_2 = arith.constant 6.000000e+00 : f32
    %3 = vector.broadcast %cst_1 : f32 to vector<2x1024xf32>
    %4 = arith.maximumf %3, %2 : vector<2x1024xf32>
    %5 = vector.broadcast %cst_2 : f32 to vector<2x1024xf32>
    %6 = arith.minimumf %5, %4 : vector<2x1024xf32>
    %cst_3 = arith.constant 0.166666672 : f32
    %7 = vector.broadcast %cst_3 : f32 to vector<2x1024xf32>
    %8 = arith.mulf %6, %7 : vector<2x1024xf32>
    %9 = arith.mulf %0, %8 : vector<2x1024xf32>
    %c0_4 = arith.constant 0 : index
    %c0_5 = arith.constant 0 : index
    %10 = vector.load %arg2[%c0_4, %c0_5] : memref<2x1024xf32, #tpu.memory_space<vmem>>, vector<2x1024xf32>
    tpu.vector_store %arg2[%c0_4, %c0_5], %9 {strides = array<i32>} : memref<2x1024xf32, #tpu.memory_space<vmem>>, vector<2x1024xf32>,
    return
  }
  func.func @transform_0(%arg0: i32) -> (i32, i32) {
    %c0_i32 = arith.constant 0 : i32
    %c0_i32_0 = arith.constant 0 : i32
    return %arg0, %c0_i32 : i32, i32
  }
  func.func @transform_1(%arg0: i32) -> (i32, i32) {
    %c0_i32 = arith.constant 0 : i32
    %c0_i32_0 = arith.constant 0 : i32
    return %arg0, %c0_i32 : i32, i32
  }
}

</mosaic_0001>

<bundles_post_ra>
// kernel: tpu_custom_call.1
= control target key start
LH: loop header
LB: loop body
LE: loop exit
PB: predicated region body
PF: predicated region fallthrough
CT: control target
= control target key end

     0   :  { %6 = vsyncpa [#allocation3], 0  ;;  %s114_s0 = inlined_call_operand.hbm [shape: f32[2,1024], index: 0, kind: input, shape index: {}]   ;;  %s115_s1 = inlined_call_operand.hbm [shape: f32[2,1024], index: 1, kind: output, shape index: {}]  }
   0x1   :  { %7 = vsyncpa [#allocation4], 0  ;;  %s96_s6 = smov [#allocation2]  }
   0x2   :  { %s14_s7 = sshll.u32 %s96_s6, 4  ;;  %s15_s7 = int_to_ptr.vmem [resolvable:$true] %s14_s7 }
   0x3   :  { %s60_s8 = scalar_lea.vmem %s15_s7, 256  ;;  %p65_p1 = scmp.lt.s32.totalorder %s15_s7, %s15_s7 }
   0x4   :  { %p61_p0 = scmp.ne.s32.totalorder %s15_s7, %s60_s8  ;;  %p66_p2 = scmp.lt.s32.totalorder %s60_s8, %s60_s8 }
   0x6   :  { %p67_p3 = por %p66_p2, %p65_p1 }
   0x8   :  { %p68_p4 = pnand %p67_p3, %p61_p0 }
   0xa   :  { %71 = shalt.err (!%p68_p4)
}
   0xb   :  { %17 = dma.hbm_to_vmem [thread:$0]  %s114_s0, 256, %s15_s7, [#allocation3]  }
   0xc   :  { %92 = dma.done.wait [#allocation3], 256  }
   0xd   :  { %93 = vsyncadd [#allocation3], 4294967040  ;;  %v21_v0 = vld [vmem:[#allocation2] sm:$0xff]  ;;  %v22_v1 = vld [vmem:[#allocation2 + $0x8] sm:$0xff]  ;;  %s97_s11 = smov [#allocation5]  }
   0xe   :  { %v23_v2 = vadd.f32 3.0, %v21_v0  ;;  %v24_v3 = vadd.f32 3.0, %v22_v1  ;;  %s41_s12 = sshll.u32 %s97_s11, 4  ;;  %s42_s12 = int_to_ptr.vmem [resolvable:$true] %s41_s12 }
   0xf   :  { %s72_s0 = scalar_lea.vmem %s42_s12, 256  ;;  %p77_p6 = scmp.lt.s32.totalorder %s42_s12, %s42_s12 }
  0x10   :  { %v25_v4 = vmax.f32 %v23_v2, 0.0  ;;  %v26_v5 = vmax.f32 %v24_v3, 0.0  ;;  %p73_p5 = scmp.ne.s32.totalorder %s42_s12, %s72_s0  ;;  %p78_p7 = scmp.lt.s32.totalorder %s72_s0, %s72_s0 }
  0x12   :  { %v27_v6 = vmin.f32 %v25_v4, 6.0  ;;  %v28_v7 = vmin.f32 %v26_v5, 6.0  ;;  %p79_p8 = por %p78_p7, %p77_p6 }
  0x14   :  { %v29_v8 = vmul.f32 0.16666667, %v27_v6  ;;  %v30_v9 = vmul.f32 0.16666667, %v28_v7  ;;  %p80_p9 = pnand %p79_p8, %p73_p5 }
  0x16   :  { %v31_v10 = vmul.f32 %v29_v8, %v21_v0  ;;  %v32_v11 = vmul.f32 %v30_v9, %v22_v1 }
  0x18   :  { %33 = vst [vmem:[#allocation5] sm:$0xff] %v31_v10  ;;  %34 = vst [vmem:[#allocation5 + $0x8] sm:$0xff] %v32_v11 }
  0x19   :  { %83 = shalt.err (!%p80_p9)
}
  0x1a   :  { %44 = dma.vmem_to_hbm [thread:$0]  %s42_s12, 256, %s115_s1, [#allocation4]  }
  0x1b   :  { %94 = dma.done.wait [#allocation4], 256  }
  0x1c   :  { %95 = vsyncadd [#allocation4], 4294967040 }
  0x1d   :  { %48 = vsyncpa [#allocation3], 1 }
  0x1e   :  { %49 = vsyncpa [#allocation4], 1 }

</bundles_post_ra>
